<compile_context>
chip_gen: v7x
topology: tpu7x:2x2x1
jax: 0.10.0
libtpu: 0.0.40
codegen_flags: <defaults>
</compile_context>

<pallas_src>
import functools

import jax
import jax.numpy as jnp
from jax.experimental import pallas as pl
from jax.experimental.pallas import tpu as pltpu


def _round_up(v: int, m: int) -> int:
    return ((v + m - 1) // m) * m


def _tv1d_kernel(x_ref, out_ref, *, tb: int, n_rows: int, mask_rows: bool):
    xb = x_ref[...]                                   # (tb, L), native dtype
    L = xb.shape[-1]

    # Neighbour along the lane axis via a full-width rotate (XLU slot).
    # With shift=+1 (jnp.roll convention) nbr[:, j] = xb[:, j-1]; lane 0
    # carries the wrap term |x[:, 0] - x[:, L-1]|, zeroed out below.
    nbr = pltpu.roll(xb, shift=1, axis=1)

    # Upcast only inside the subtraction -> no full f32 tile in VMEM.
    d = jnp.abs(xb.astype(jnp.float32) - nbr.astype(jnp.float32))    # (tb, L)

    lane = jax.lax.broadcasted_iota(jnp.int32, d.shape, 1)
    valid = lane > 0                                   # drop the wrap lane
    if mask_rows:
        row = pl.program_id(0) * tb + jax.lax.broadcasted_iota(jnp.int32, d.shape, 0)
        valid = jnp.logical_and(valid, row < n_rows)   # drop out-of-range rows
    d = jnp.where(valid, d, 0.0)

    # Sublane-only reduce (VPU adds across vregs); the cross-lane reduce is
    # deferred to JAX outside the kernel, keeping the output lane-dense.
    out_ref[...] = jnp.sum(d, axis=0, keepdims=True).reshape(1, 1, L)


def tv1d_loss(x: jax.Array, *, target_block_bytes: int = 2 * 1024 * 1024) -> jax.Array:
    """x: (B, L) -> scalar TV-1D loss (float32). Matches mean(|x[:,:-1]-x[:,1:]|)."""
    B, L = x.shape
    if L < 2:
        raise ValueError("TV1dLoss needs at least 2 elements along axis 1.")

    itemsize = jnp.dtype(x.dtype).itemsize
    if B <= 8:
        tb = B                       # single block; block dim == full array dim
    else:
        # Rows per block: ~target_block_bytes of input per buffer, multiple of 8.
        tb_budget = max(8, (target_block_bytes // (L * itemsize)) // 8 * 8)
        # Keep at least 4 grid steps when the batch allows (pipelining + megacore).
        tb_grid_cap = max(8, _round_up(pl.cdiv(B, 4), 8))
        tb = min(tb_budget, tb_grid_cap, _round_up(B, 8))
    grid = pl.cdiv(B, tb)
    mask_rows = (grid * tb != B)     # last block overruns the batch; mask, don't pad

    kernel = functools.partial(_tv1d_kernel, tb=tb, n_rows=B, mask_rows=mask_rows)

    partials = pl.pallas_call(
        kernel,
        out_shape=jax.ShapeDtypeStruct((grid, 1, L), jnp.float32),
        grid_spec=pltpu.PrefetchScalarGridSpec(
            num_scalar_prefetch=0,
            grid=(grid,),
            in_specs=[pl.BlockSpec((tb, L), lambda i: (i, 0))],
            out_specs=pl.BlockSpec((1, 1, L), lambda i: (i, 0, 0)),
        ),
        compiler_params=pltpu.CompilerParams(
            dimension_semantics=("parallel",),   # independent blocks -> megacore OK
            vmem_limit_bytes=32 * 1024 * 1024,
        ),
        cost_estimate=pl.CostEstimate(
            flops=3 * B * L,
            transcendentals=0,
            bytes_accessed=B * L * itemsize + grid * L * 4,
        ),
    )(x)

    # Final cross-block / cross-lane reduce + mean denominator in plain JAX.
    return jnp.sum(partials) / (B * (L - 1))


def tv1d_loss_ref(x: jax.Array) -> jax.Array:
    x = x.astype(jnp.float32)
    return jnp.mean(jnp.abs(x[:, :-1] - x[:, 1:]))


if __name__ == "__main__":
    # Primary check: small (batch, length) input, single block, f32.
    x = jax.random.normal(jax.random.PRNGKey(0), (8, 128), dtype=jnp.float32)
    loss = jax.block_until_ready(tv1d_loss(x))
    ref = jax.block_until_ready(tv1d_loss_ref(x))
    assert jnp.allclose(loss, ref, rtol=1e-5, atol=1e-6), (loss, ref)

    # Secondary check: bf16 input with a batch that is not a multiple of the
    # block size (exercises the masked last block + multi-step parallel grid).
    x2 = jax.random.normal(jax.random.PRNGKey(0), (50, 128), dtype=jnp.bfloat16)
    loss2 = jax.block_until_ready(tv1d_loss(x2))
    ref2 = jax.block_until_ready(tv1d_loss_ref(x2))
    assert jnp.allclose(loss2, ref2, rtol=2e-4, atol=1e-5), (loss2, ref2)

    print("KERNEL_OK")
</pallas_src>

<mosaic_0001>
module attributes {stable_mosaic.version = 11 : i64} {
  func.func @_tv1d_kernel(%arg0: i32, %arg1: memref<8x128xf32, #tpu.memory_space<vmem>>, %arg2: memref<1x1x128xf32, #tpu.memory_space<vmem>>) attributes {dimension_semantics = [#tpu.dimension_semantics<parallel>], iteration_bounds = array<i64: 1>, scalar_prefetch = 0 : i64, scratch_operands = 0 : i64, tpu.core_type = #tpu.core_type<tc>, window_params = [{transform_indices = @transform_0, window_bounds = array<i64: 8, 128>}, {transform_indices = @transform_1, window_bounds = array<i64: 1, 1, 128>}]} {
    %c0 = arith.constant 0 : index
    %c0_0 = arith.constant 0 : index
    %0 = vector.load %arg1[%c0, %c0_0] : memref<8x128xf32, #tpu.memory_space<vmem>>, vector<8x128xf32>
    %c1_i32 = arith.constant 1 : i32
    %1 = tpu.dynamic_rotate %0 by %c1_i32 dim 1 : vector<8x128xf32>, i32 -> vector<8x128xf32>
    %2 = arith.subf %0, %1 : vector<8x128xf32>
    %3 = math.absf %2 : vector<8x128xf32>
    %4 = tpu.iota {dimensions = array<i32: 1>} : vector<8x128xi32>
    %c0_i32 = arith.constant 0 : i32
    %5 = vector.broadcast %c0_i32 : i32 to vector<8x128xi32>
    %6 = arith.cmpi sgt, %4, %5 : vector<8x128xi32>
    %cst = arith.constant 0.000000e+00 : f32
    %7 = vector.broadcast %cst : f32 to vector<8x128xf32>
    %8 = arith.select %6, %3, %7 : vector<8x128xi1>, vector<8x128xf32>
    %cst_1 = arith.constant dense<0.000000e+00> : vector<128xf32>
    %9 = vector.multi_reduction <add>, %8, %cst_1 [0] : vector<8x128xf32> to vector<128xf32>
    %10 = vector.shape_cast %9 : vector<128xf32> to vector<1x128xf32>
    %11 = vector.shape_cast %10 : vector<1x128xf32> to vector<1x1x128xf32>
    %c0_2 = arith.constant 0 : index
    %c0_3 = arith.constant 0 : index
    %c0_4 = arith.constant 0 : index
    %12 = vector.load %arg2[%c0_2, %c0_3, %c0_4] : memref<1x1x128xf32, #tpu.memory_space<vmem>>, vector<1x1x128xf32>
    tpu.vector_store %arg2[%c0_2, %c0_3, %c0_4], %11 {strides = array<i32>} : memref<1x1x128xf32, #tpu.memory_space<vmem>>, vector<1x1x128xf32>,
    return
  }
  func.func @transform_0(%arg0: i32) -> (i32, i32) {
    %c0_i32 = arith.constant 0 : i32
    %c0_i32_0 = arith.constant 0 : i32
    return %arg0, %c0_i32 : i32, i32
  }
  func.func @transform_1(%arg0: i32) -> (i32, i32, i32) {
    %c0_i32 = arith.constant 0 : i32
    %c0_i32_0 = arith.constant 0 : i32
    %c0_i32_1 = arith.constant 0 : i32
    return %arg0, %c0_i32, %c0_i32_0 : i32, i32, i32
  }
}

</mosaic_0001>

<bundles_post_ra>
// kernel: tpu_custom_call.1
= control target key start
LH: loop header
LB: loop body
LE: loop exit
PB: predicated region body
PF: predicated region fallthrough
CT: control target
= control target key end

     0   :  { %6 = vsyncpa [#allocation3], 0  ;;  %s140_s0 = inlined_call_operand.hbm [shape: f32[8,128], index: 0, kind: input, shape index: {}]   ;;  %s141_s1 = inlined_call_operand.hbm [shape: f32[1,1,128], index: 1, kind: output, shape index: {}]  }
   0x1   :  { %7 = vsyncpa [#allocation4], 0  ;;  %s103_s6 = smov [#allocation2]   ;;  %s55_s10 = scalar_lea.hbm %s140_s0, 128 }
   0x2   :  { %s14_s7 = sshll.u32 %s103_s6, 4  ;;  %p56_p0 = scmp.ne.s32.totalorder %s140_s0, %s55_s10  ;;  %s15_s7 = int_to_ptr.vmem [resolvable:$true] %s14_s7 }
   0x3   :  { %p59_p1 = scmp.lt.u32.totalorder %s55_s10, %s140_s0 }
   0x5   :  { %p61_p2 = pnand %p59_p1, %p56_p0 }
   0x7   :  { %64 = shalt.err (!%p61_p2)
}
   0x8   :  { %s65_s15 = scalar_lea.vmem %s15_s7, 128  ;;  %p70_p4 = scmp.lt.s32.totalorder %s15_s7, %s15_s7 }
   0x9   :  { %p66_p3 = scmp.ne.s32.totalorder %s15_s7, %s65_s15  ;;  %p71_p5 = scmp.lt.s32.totalorder %s65_s15, %s65_s15 }
   0xb   :  { %p72_p6 = por %p71_p5, %p70_p4 }
   0xd   :  { %p73_p7 = pnand %p72_p6, %p66_p3 }
   0xf   :  { %76 = shalt.err (!%p73_p7)
}
  0x10   :  { %17 = dma.hbm_to_vmem [thread:$0]  %s140_s0, 128, %s15_s7, [#allocation3]  }
  0x11   :  { %99 = dma.done.wait [#allocation3], 128  }
  0x12   :  { %100 = vsyncadd [#allocation3], 4294967168  ;;  %v21_v0 = vld [vmem:[#allocation2] sm:$0xff]  ;;  %s104_s18 = smov 1   ;;  %v26_v1 = vlaneseq  ;;  %s105_s19 = smov [#allocation5]  }
  0x13   :  { %22 = vrot.lane.b32.xlu0 %v21_v0, %s104_s18  ;;  %s43_s20 = sshll.u32 %s105_s19, 4  ;;  %s44_s20 = int_to_ptr.vmem [resolvable:$true] %s43_s20 }
  0x14   :  { %v27_v2 = vand.u32 127, %v26_v1  ;;  %s77_s0 = scalar_lea.vmem %s44_s20, 16  ;;  %s81_s21 = scalar_lea.vmem %s44_s20, 32 }
  0x15   :  { %p78_p8 = scmp.ne.s32.totalorder %s44_s20, %s77_s0  ;;  %p82_p9 = scmp.lt.s32.totalorder %s44_s20, %s44_s20 }
  0x16   :  { %vm28_vm0 = vcmp.gt.s32.totalorder %v27_v2, 0  ;;  %p83_p10 = scmp.lt.s32.totalorder %s81_s21, %s77_s0 }
  0x18   :  { %p84_p11 = por %p83_p10, %p82_p9 }
  0x1a   :  { %p85_p12 = pnand %p84_p11, %p78_p8 }
  0x85   :  { %v23_v3 = vpop.permute.xlu0 %22 }
  0x86   :  { %v24_v4 = vsub.f32 %v21_v0, %v23_v3 }
  0x88   :  { %v25_v5 = vand.u32 2147483647, %v24_v4 }
  0x8a   :  { %v29_v6 = vsel %vm28_vm0, %v25_v5, 0.0 }
  0x8b   :  { %v30_v7 = vrot.slane %v29_v6, 4 }
  0x8d   :  { %v31_v8 = vadd.f32 %v30_v7, %v29_v6 }
  0x8f   :  { %v32_v9 = vrot.slane %v31_v8, 2 }
  0x91   :  { %v33_v10 = vadd.f32 %v32_v9, %v31_v8 }
  0x93   :  { %v34_v11 = vrot.slane %v33_v10, 1 }
  0x95   :  { %v35_v12 = vadd.f32 %v34_v11, %v33_v10 }
  0x97   :  { %36 = vst [vmem:[#allocation5] sm:$0x1] %v35_v12 }
  0x98   :  { %88 = shalt.err (!%p85_p12)
}
  0x99   :  { %s89_s24 = scalar_lea.hbm %s141_s1, 16 }
  0x9a   :  { %p90_p13 = scmp.ne.s32.totalorder %s141_s1, %s89_s24  ;;  %p93_p0 = scmp.lt.u32.totalorder %s89_s24, %s141_s1 }
  0x9c   :  { %p95_p1 = pnand %p93_p0, %p90_p13 }
  0x9e   :  { %98 = shalt.err (!%p95_p1)
}
  0x9f   :  { %46 = dma.vmem_to_hbm [thread:$0]  %s44_s20, 16, %s141_s1, [#allocation4]  }
  0xa0   :  { %101 = dma.done.wait [#allocation4], 16  }
  0xa1   :  { %102 = vsyncadd [#allocation4], 4294967280 }
  0xa2   :  { %50 = vsyncpa [#allocation3], 1 }
  0xa3   :  { %51 = vsyncpa [#allocation4], 1 }

</bundles_post_ra>
